<compile_context>
chip_gen: v7x
topology: tpu7x:2x2x1
jax: 0.10.0
libtpu: 0.0.40
codegen_flags: <defaults>
</compile_context>

<pallas_src>
import functools
import math

import jax
import jax.numpy as jnp
from jax.experimental import pallas as pl
from jax.experimental.pallas import tpu as pltpu


# ----------------------------- Pallas identity kernel -----------------------------

def _dma_identity_kernel(x_hbm_ref, o_hbm_ref, sem):
    # Single HBM->HBM DMA of the whole array.  No VMEM staging, no vld/vst slots,
    # no grid, no (8,128) tiling constraint: works for any shape/dtype as-is.
    cp = pltpu.make_async_copy(x_hbm_ref, o_hbm_ref, sem)
    cp.start()
    cp.wait()


@functools.lru_cache(maxsize=None)
def _build_dma_copy(shape: tuple, dtype_name: str):
    """Compile (and cache) a pallas_call HBM->HBM identity copy for (shape, dtype)."""
    dtype = jnp.dtype(dtype_name)
    nbytes = int(math.prod(shape)) * dtype.itemsize
    copy = pl.pallas_call(
        _dma_identity_kernel,
        out_shape=jax.ShapeDtypeStruct(shape, dtype),
        in_specs=[pl.BlockSpec(memory_space=pl.ANY)],   # raw ref, no auto-DMA / tiling
        out_specs=pl.BlockSpec(memory_space=pl.ANY),
        scratch_shapes=[pltpu.SemaphoreType.DMA(())],
        cost_estimate=pl.CostEstimate(
            flops=0,
            transcendentals=0,
            bytes_accessed=2 * nbytes,                  # mem-bound hint for the scheduler
        ),
    )
    return jax.jit(copy)


def _pallas_identity(x: jax.Array) -> jax.Array:
    """Bit-exact identity of an arbitrary-shaped array via a single Pallas DMA."""
    if x.size == 0:
        # Zero-byte DMA is pointless; JAX arrays are immutable so returning the
        # stored buffer is observationally identical to a copy.
        return x
    if x.ndim == 0:
        # Route 0-d scalars through a 1-element 1-D copy (metadata-only reshape).
        y = _build_dma_copy((1,), jnp.dtype(x.dtype).name)(x.reshape(1))
        return y.reshape(())
    return _build_dma_copy(tuple(x.shape), jnp.dtype(x.dtype).name)(x)


# ----------------------------- ParameterHolder -----------------------------

class ParameterHolder:
    """JAX port of wormlab3d.nn.parameter_holder.ParameterHolder."""

    def __init__(self):
        # Mirrors nn.Module._parameters; requires_grad flag kept for parity.
        self._parameters = {}
        self._requires_grad = {}

    def forward(self):
        raise RuntimeError('The forward method of this model is not enabled!')

    def __call__(self):
        return self.forward()

    def get(self, key: str) -> jax.Array:
        # Retrieval routed through the Pallas HBM->HBM DMA copy kernel (identity).
        return _pallas_identity(self._parameters[key])

    def set(self, key: str, value: jax.Array, requires_grad: bool = False):
        if key in self._parameters:
            # Equivalent of `param.data = value` (shape/dtype may change freely).
            self._parameters[key] = value
        else:
            # Equivalent of register_parameter(key, nn.Parameter(value, requires_grad))
            self._parameters[key] = value
            self._requires_grad[key] = requires_grad
        # TODO(synk): requires_grad has no runtime effect here; JAX grads are
        # determined at transform time, not by per-array flags.


# ----------------------------- Demo / self-test -----------------------------

if __name__ == "__main__":
    key = jax.random.PRNGKey(0)
    k1, k2, k3, k4 = jax.random.split(key, 4)

    holder = ParameterHolder()

    # Deterministic example "parameters" at small shapes.
    p_points = jax.random.normal(k1, (2, 4, 16, 16), dtype=jnp.float32)   # 4-D, odd last dim
    p_lengths = jax.random.uniform(k2, (8, 32), dtype=jnp.float32)        # 2-D, non-128 last dim
    p_scalar = jax.random.normal(k3, (3,), dtype=jnp.float32)             # tiny 1-D
    p_weights = jax.random.normal(k4, (16, 256), dtype=jnp.bfloat16)      # lane-aligned bf16
    p_gain = jnp.float32(1.5)                                             # 0-d scalar

    holder.set("points", p_points, requires_grad=True)
    holder.set("lengths", p_lengths)
    holder.set("scale", p_scalar)
    holder.set("weights", p_weights)
    holder.set("gain", p_gain)
    holder.set("empty", jnp.zeros((0, 4), dtype=jnp.float32))

    # Overwrite-an-existing-key path (param.data = value).
    p_scalar2 = p_scalar * 2.0
    holder.set("scale", p_scalar2)

    # get() runs the Pallas DMA identity kernel on device.
    got_points = jax.block_until_ready(holder.get("points"))
    got_lengths = jax.block_until_ready(holder.get("lengths"))
    got_scale = jax.block_until_ready(holder.get("scale"))
    got_weights = jax.block_until_ready(holder.get("weights"))
    got_gain = jax.block_until_ready(holder.get("gain"))
    got_empty = holder.get("empty")

    assert got_points.shape == p_points.shape and got_points.dtype == p_points.dtype
    assert bool(jnp.all(got_points == p_points))
    assert bool(jnp.all(got_lengths == p_lengths))
    assert bool(jnp.all(got_scale == p_scalar2))
    assert got_weights.dtype == jnp.bfloat16
    assert bool(jnp.all(got_weights == p_weights))
    assert got_gain.shape == () and bool(got_gain == p_gain)
    assert got_empty.shape == (0, 4)

    # forward() must raise exactly like the PyTorch module.
    raised = False
    try:
        holder()
    except RuntimeError as e:
        raised = str(e) == 'The forward method of this model is not enabled!'
    assert raised

    print("KERNEL_OK")
</pallas_src>

<mosaic_0001>
module attributes {stable_mosaic.version = 11 : i64} {
  func.func @_dma_identity_kernel(%arg0: memref<2x4x16x16xf32, #tpu.memory_space<any>>, %arg1: memref<2x4x16x16xf32, #tpu.memory_space<any>>, %arg2: memref<!tpu.dma_semaphore, #tpu.memory_space<semaphore_mem>>) attributes {dimension_semantics = [], scalar_prefetch = 0 : i64, scratch_operands = 1 : i64, tpu.core_type = #tpu.core_type<tc>} {
    tpu.enqueue_dma source(%arg0 : memref<2x4x16x16xf32, #tpu.memory_space<any>>) target(%arg1 : memref<2x4x16x16xf32, #tpu.memory_space<any>>) target_semaphore(%arg2 : memref<!tpu.dma_semaphore, #tpu.memory_space<semaphore_mem>>)
    tpu.wait_dma2 semaphore(%arg2 : memref<!tpu.dma_semaphore, #tpu.memory_space<semaphore_mem>>) src(%arg0 : memref<2x4x16x16xf32, #tpu.memory_space<any>>) dst(%arg1 : memref<2x4x16x16xf32, #tpu.memory_space<any>>)
    return
  }
}

</mosaic_0001>

<bundles_post_ra>
// kernel: tpu_custom_call.1
= control target key start
LH: loop header
LB: loop body
LE: loop exit
PB: predicated region body
PF: predicated region fallthrough
CT: control target
= control target key end

     0   :  { %s36_s6 = smov [#allocation2]   ;;  %s37_s7 = smov [#allocation3]   ;;  %s55_s0 = inlined_call_operand.hbm [shape: f32[2,4,16,16], index: 0, kind: input, shape index: {}]   ;;  %s56_s1 = inlined_call_operand.hbm [shape: f32[2,4,16,16], index: 1, kind: output, shape index: {}]  }
   0x1   :  { %s38_s8 = smov 0  }
   0x2   :  { %18 = dma.general %s55_s0, 2048, %s56_s1, %s36_s6, %s37_s7, [#allocation4], %s38_s8, 0  }
   0x3   :  { %34 = dma.done.wait [#allocation2], 2048 }
   0x4   :  { %35 = vsyncadd [#allocation2], 4294965248 }
   0x5   :  { %24 = vsyncmov [#allocation2] }
   0x8   :  { %s25_s13 = vpop.sfrf %24 }
   0x9   :  { %p30_p0 = scmp.ne.s32.totalorder %s25_s13, 0 }
   0xb   :  { %29 = shalt.err (%p30_p0)  }

</bundles_post_ra>
